<compile_context>
chip_gen: v6e
topology: v6e:2x2x1
jax: 0.10.0
libtpu: 0.0.40
codegen_flags: <defaults>
</compile_context>

<pallas_src>
import functools

import jax
import jax.numpy as jnp
from jax.experimental import pallas as pl
from jax.experimental.pallas import tpu as pltpu


def _make_bce_kernel(has_w, has_pw, has_m, pad_ind, tl, write_loss):
    """Build a BCE-with-logits kernel specialized on the static config."""

    def kernel(*refs):
        idx = 0
        x_ref = refs[idx]; idx += 1          # (B, tl) logits, native dtype
        t_ref = refs[idx]; idx += 1          # (B, tl) targets in {0,1}
        w_ref = None
        pw_ref = None
        m_ref = None
        if has_w:
            w_ref = refs[idx]; idx += 1      # (B, 1)  per-batch weight (f32)
        if has_pw:
            pw_ref = refs[idx]; idx += 1     # (1, tl) per-class pos_weight (f32)
        if has_m:
            m_ref = refs[idx]; idx += 1      # (B, tl) mask (1 = keep)
        out_ref = refs[idx]                  # (B, tl) loss  OR  (1,1,1) partial sum

        x = x_ref[...].astype(jnp.float32)
        t = t_ref[...].astype(jnp.float32)

        # PyTorch-stable formulation:
        #   softplus(-x) = log1p(exp(-|x|)) + max(-x, 0)
        #   log_weight   = (pos_weight - 1) * target + 1
        #   loss         = (1 - t) * x + log_weight * softplus(-x)
        sp = jnp.log1p(jnp.exp(-jnp.abs(x))) + jnp.maximum(-x, 0.0)

        if has_pw:
            lw = (pw_ref[...].astype(jnp.float32) - 1.0) * t + 1.0
            loss = (1.0 - t) * x + lw * sp
        else:
            loss = (1.0 - t) * x + sp

        if has_w:
            loss = loss * w_ref[...].astype(jnp.float32)

        if pad_ind is not None:
            # _mask_at_pad: zero the loss at the (static) padding class index.
            i = pl.program_id(0)
            col = jax.lax.broadcasted_iota(jnp.int32, loss.shape, 1) + i * tl
            loss = jnp.where(col == pad_ind, 0.0, loss)

        if has_m:
            # _mask: elementwise mask.
            loss = loss * m_ref[...].astype(jnp.float32)

        if write_loss:
            out_ref[...] = loss
        else:
            out_ref[...] = jnp.sum(loss).reshape(1, 1, 1)

    return kernel


@functools.partial(jax.jit, static_argnames=("pad_ind", "reduction", "tl"))
def bce_with_logits_loss(logits, target, weight=None, pos_weight=None,
                         mask=None, pad_ind=None, reduction="mean", tl=None):
    """Pallas implementation of BCEWithLogitsLoss.forward."""
    B, L = logits.shape
    assert L % 128 == 0, "number of classes must be a multiple of 128"

    has_w = weight is not None
    has_pw = pos_weight is not None
    has_m = mask is not None
    write_loss = (reduction == "none")

    if has_w:
        weight = jnp.asarray(weight).astype(jnp.float32).reshape(B, 1)
    if has_pw:
        pos_weight = jnp.asarray(pos_weight).astype(jnp.float32).reshape(1, L)
    if has_m:
        mask = jnp.asarray(mask)
        if mask.dtype == jnp.bool_:
            mask = mask.astype(jnp.bfloat16)   # 2 B/elem stream instead of bool/f32
        mask = mask.reshape(B, L)

    # --- class-tile selection: biggest lane-dense tile under a VMEM budget ---
    per_col = logits.dtype.itemsize + target.dtype.itemsize
    if has_m:
        per_col += mask.dtype.itemsize
    if write_loss:
        per_col += 4                                   # f32 loss output tile
    per_col_bytes = 2 * (B * per_col + (4 if has_pw else 0))  # double-buffered
    budget = 16 << 20                                  # ~16 MiB of pipeline buffers

    if tl is None:
        n128 = L // 128
        tl = 128
        for k in range(1, n128 + 1):
            if n128 % k:
                continue
            cand = k * 128
            if cand > 8192:
                break
            if cand * per_col_bytes <= budget:
                tl = cand
    else:
        assert tl % 128 == 0 and L % tl == 0
    n_blocks = L // tl

    # --- build specs / operands only for the streams that exist ---
    in_specs = [
        pl.BlockSpec((B, tl), lambda i: (0, i)),       # logits
        pl.BlockSpec((B, tl), lambda i: (0, i)),       # target
    ]
    operands = [logits, target]
    if has_w:
        in_specs.append(pl.BlockSpec((B, 1), lambda i: (0, 0)))
        operands.append(weight)
    if has_pw:
        in_specs.append(pl.BlockSpec((1, tl), lambda i: (0, i)))
        operands.append(pos_weight)
    if has_m:
        in_specs.append(pl.BlockSpec((B, tl), lambda i: (0, i)))
        operands.append(mask)

    if write_loss:
        out_shape = jax.ShapeDtypeStruct((B, L), jnp.float32)
        out_specs = pl.BlockSpec((B, tl), lambda i: (0, i))
    else:
        # one partial sum per grid block -> grid axis is fully parallel
        out_shape = jax.ShapeDtypeStruct((n_blocks, 1, 1), jnp.float32)
        out_specs = pl.BlockSpec((1, 1, 1), lambda i: (i, 0, 0))

    kernel = _make_bce_kernel(has_w, has_pw, has_m, pad_ind, tl, write_loss)

    out = pl.pallas_call(
        kernel,
        out_shape=out_shape,
        grid=(n_blocks,),
        in_specs=in_specs,
        out_specs=out_specs,
        compiler_params=pltpu.CompilerParams(
            dimension_semantics=("parallel",),
            vmem_limit_bytes=32 << 20),
    )(*operands)

    # _reduce(...).unsqueeze(0)
    if write_loss:
        return out[None, ...]                          # (1, B, L)
    total = jnp.sum(out)                               # tree-reduce partial sums
    if reduction == "mean":
        total = total / (B * L)
    return total.reshape(1)
    # TODO(synk): for very large B, additionally tile the batch axis (tb, tl)
    # so full-B blocks don't dominate the (smaller) v7x VMEM budget.


def _reference(logits, target, weight, pos_weight, mask, pad_ind, reduction):
    """Plain-JAX reference mirroring F.binary_cross_entropy_with_logits."""
    x = logits.astype(jnp.float32)
    t = target.astype(jnp.float32)
    sp = jnp.log1p(jnp.exp(-jnp.abs(x))) + jnp.maximum(-x, 0.0)
    if pos_weight is not None:
        lw = (jnp.asarray(pos_weight, jnp.float32).reshape(1, -1) - 1.0) * t + 1.0
    else:
        lw = 1.0
    loss = (1.0 - t) * x + lw * sp
    if weight is not None:
        loss = loss * jnp.asarray(weight, jnp.float32).reshape(-1, 1)
    if pad_ind is not None:
        loss = loss.at[:, pad_ind].set(0.0)
    if mask is not None:
        loss = loss * jnp.asarray(mask, jnp.float32)
    if reduction == "mean":
        return jnp.mean(loss)[None]
    elif reduction == "sum":
        return jnp.sum(loss)[None]
    return loss[None]


if __name__ == "__main__":
    key = jax.random.PRNGKey(0)
    k1, k2, k3, k4, k5 = jax.random.split(key, 5)

    B, L = 8, 512
    pad_ind = 5

    logits = jax.random.normal(k1, (B, L), jnp.float32) * 2.0
    target = (jax.random.uniform(k2, (B, L)) > 0.7).astype(jnp.float32)
    weight = jax.random.uniform(k3, (B,), jnp.float32, 0.5, 1.5)       # per-batch
    pos_weight = jax.random.uniform(k4, (L,), jnp.float32, 0.5, 2.0)   # per-class
    mask = (jax.random.uniform(k5, (B, L)) > 0.1).astype(jnp.float32)

    # mean reduction, all optional operands present
    out_mean = bce_with_logits_loss(logits, target, weight=weight,
                                    pos_weight=pos_weight, mask=mask,
                                    pad_ind=pad_ind, reduction="mean")
    out_mean = jax.block_until_ready(out_mean)
    ref_mean = _reference(logits, target, weight, pos_weight, mask,
                          pad_ind, "mean")
    assert out_mean.shape == (1,)
    assert jnp.allclose(out_mean, ref_mean, rtol=1e-5, atol=1e-6), (out_mean, ref_mean)

    # sum reduction, specialized fast path: only the two mandatory streams
    out_sum = bce_with_logits_loss(logits, target, reduction="sum")
    out_sum = jax.block_until_ready(out_sum)
    ref_sum = _reference(logits, target, None, None, None, None, "sum")
    assert out_sum.shape == (1,)
    assert jnp.allclose(out_sum, ref_sum, rtol=1e-5, atol=1e-4), (out_sum, ref_sum)

    # 'none' reduction: per-element loss matrix (unsqueezed)
    out_none = bce_with_logits_loss(logits, target, weight=weight,
                                    pos_weight=pos_weight, mask=mask,
                                    pad_ind=pad_ind, reduction="none")
    out_none = jax.block_until_ready(out_none)
    ref_none = _reference(logits, target, weight, pos_weight, mask,
                          pad_ind, "none")
    assert out_none.shape == (1, B, L)
    assert jnp.allclose(out_none, ref_none, rtol=1e-5, atol=1e-5)

    print("KERNEL_OK")
</pallas_src>

<mosaic_0001>
module attributes {stable_mosaic.version = 11 : i64} {
  func.func @kernel(%arg0: i32, %arg1: memref<8x512xf32, #tpu.memory_space<vmem>>, %arg2: memref<8x512xf32, #tpu.memory_space<vmem>>, %arg3: memref<8x1xf32, #tpu.memory_space<vmem>>, %arg4: memref<1x512xf32, #tpu.memory_space<vmem>>, %arg5: memref<8x512xf32, #tpu.memory_space<vmem>>, %arg6: memref<1x1x1xf32, #tpu.memory_space<vmem>>) attributes {dimension_semantics = [#tpu.dimension_semantics<parallel>], iteration_bounds = array<i64: 1>, scalar_prefetch = 0 : i64, scratch_operands = 0 : i64, tpu.core_type = #tpu.core_type<tc>, window_params = [{transform_indices = @transform_0, window_bounds = array<i64: 8, 512>}, {transform_indices = @transform_1, window_bounds = array<i64: 8, 512>}, {pipeline_mode = #tpu.pipeline_mode<synchronous>, transform_indices = @transform_2, window_bounds = array<i64: 8, 1>}, {transform_indices = @transform_3, window_bounds = array<i64: 1, 512>}, {transform_indices = @transform_4, window_bounds = array<i64: 8, 512>}, {transform_indices = @transform_5, window_bounds = array<i64: 1, 1, 1>}]} {
    %c0 = arith.constant 0 : index
    %c0_0 = arith.constant 0 : index
    %0 = vector.load %arg1[%c0, %c0_0] : memref<8x512xf32, #tpu.memory_space<vmem>>, vector<8x512xf32>
    %c0_1 = arith.constant 0 : index
    %c0_2 = arith.constant 0 : index
    %1 = vector.load %arg2[%c0_1, %c0_2] : memref<8x512xf32, #tpu.memory_space<vmem>>, vector<8x512xf32>
    %2 = math.absf %0 : vector<8x512xf32>
    %cst = arith.constant 0.000000e+00 : f32
    %3 = vector.broadcast %cst : f32 to vector<8x512xf32>
    %4 = arith.subf %3, %2 : vector<8x512xf32>
    %5 = math.exp %4 : vector<8x512xf32>
    %6 = math.log1p %5 : vector<8x512xf32>
    %cst_3 = arith.constant 0.000000e+00 : f32
    %7 = vector.broadcast %cst_3 : f32 to vector<8x512xf32>
    %8 = arith.subf %7, %0 : vector<8x512xf32>
    %cst_4 = arith.constant 0.000000e+00 : f32
    %9 = vector.broadcast %cst_4 : f32 to vector<8x512xf32>
    %10 = arith.maximumf %8, %9 : vector<8x512xf32>
    %11 = arith.addf %6, %10 : vector<8x512xf32>
    %c0_5 = arith.constant 0 : index
    %c0_6 = arith.constant 0 : index
    %12 = vector.load %arg4[%c0_5, %c0_6] : memref<1x512xf32, #tpu.memory_space<vmem>>, vector<1x512xf32>
    %cst_7 = arith.constant 1.000000e+00 : f32
    %13 = vector.broadcast %cst_7 : f32 to vector<1x512xf32>
    %14 = arith.subf %12, %13 : vector<1x512xf32>
    %15 = vector.broadcast %14 : vector<1x512xf32> to vector<8x512xf32>
    %16 = arith.mulf %15, %1 : vector<8x512xf32>
    %cst_8 = arith.constant 1.000000e+00 : f32
    %17 = vector.broadcast %cst_8 : f32 to vector<8x512xf32>
    %18 = arith.addf %16, %17 : vector<8x512xf32>
    %cst_9 = arith.constant 1.000000e+00 : f32
    %19 = vector.broadcast %cst_9 : f32 to vector<8x512xf32>
    %20 = arith.subf %19, %1 : vector<8x512xf32>
    %21 = arith.mulf %20, %0 : vector<8x512xf32>
    %22 = arith.mulf %18, %11 : vector<8x512xf32>
    %23 = arith.addf %21, %22 : vector<8x512xf32>
    %c0_10 = arith.constant 0 : index
    %c0_11 = arith.constant 0 : index
    %24 = vector.load %arg3[%c0_10, %c0_11] : memref<8x1xf32, #tpu.memory_space<vmem>>, vector<8x1xf32>
    %25 = vector.broadcast %24 : vector<8x1xf32> to vector<8x512xf32>
    %26 = arith.mulf %23, %25 : vector<8x512xf32>
    %27 = tpu.iota {dimensions = array<i32: 1>} : vector<8x512xi32>
    %c512_i32 = arith.constant 512 : i32
    %28 = arith.muli %arg0, %c512_i32 : i32
    %29 = vector.broadcast %28 : i32 to vector<8x512xi32>
    %30 = arith.addi %27, %29 : vector<8x512xi32>
    %c5_i32 = arith.constant 5 : i32
    %31 = vector.broadcast %c5_i32 : i32 to vector<8x512xi32>
    %32 = arith.cmpi eq, %30, %31 : vector<8x512xi32>
    %cst_12 = arith.constant 0.000000e+00 : f32
    %33 = vector.broadcast %cst_12 : f32 to vector<8x512xf32>
    %34 = arith.select %32, %33, %26 : vector<8x512xi1>, vector<8x512xf32>
    %c0_13 = arith.constant 0 : index
    %c0_14 = arith.constant 0 : index
    %35 = vector.load %arg5[%c0_13, %c0_14] : memref<8x512xf32, #tpu.memory_space<vmem>>, vector<8x512xf32>
    %36 = arith.mulf %34, %35 : vector<8x512xf32>
    %37 = vector.shape_cast %36 : vector<8x512xf32> to vector<1x8x512xf32>
    %cst_15 = arith.constant dense<0.000000e+00> : vector<1xf32>
    %38 = vector.multi_reduction <add>, %37, %cst_15 [1, 2] : vector<1x8x512xf32> to vector<1xf32>
    %39 = vector.shape_cast %38 : vector<1xf32> to vector<1x1x1xf32>
    %40 = vector.extract %39[0, 0, 0] : f32 from vector<1x1x1xf32>
    %41 = vector.broadcast %40 : f32 to vector<1x1x1xf32>
    %c0_16 = arith.constant 0 : index
    %c0_17 = arith.constant 0 : index
    %c0_18 = arith.constant 0 : index
    %42 = vector.load %arg6[%c0_16, %c0_17, %c0_18] : memref<1x1x1xf32, #tpu.memory_space<vmem>>, vector<1x1x1xf32>
    tpu.vector_store %arg6[%c0_16, %c0_17, %c0_18], %41 {strides = array<i32>} : memref<1x1x1xf32, #tpu.memory_space<vmem>>, vector<1x1x1xf32>,
    return
  }
  func.func @transform_0(%arg0: i32) -> (i32, i32) {
    %c0_i32 = arith.constant 0 : i32
    %c0_i32_0 = arith.constant 0 : i32
    return %c0_i32, %arg0 : i32, i32
  }
  func.func @transform_1(%arg0: i32) -> (i32, i32) {
    %c0_i32 = arith.constant 0 : i32
    %c0_i32_0 = arith.constant 0 : i32
    return %c0_i32, %arg0 : i32, i32
  }
  func.func @transform_2(%arg0: i32) -> (i32, i32) {
    %c0_i32 = arith.constant 0 : i32
    %c0_i32_0 = arith.constant 0 : i32
    %c0_i32_1 = arith.constant 0 : i32
    return %c0_i32, %c0_i32_0 : i32, i32
  }
  func.func @transform_3(%arg0: i32) -> (i32, i32) {
    %c0_i32 = arith.constant 0 : i32
    %c0_i32_0 = arith.constant 0 : i32
    return %c0_i32, %arg0 : i32, i32
  }
  func.func @transform_4(%arg0: i32) -> (i32, i32) {
    %c0_i32 = arith.constant 0 : i32
    %c0_i32_0 = arith.constant 0 : i32
    return %c0_i32, %arg0 : i32, i32
  }
  func.func @transform_5(%arg0: i32) -> (i32, i32, i32) {
    %c0_i32 = arith.constant 0 : i32
    %c0_i32_0 = arith.constant 0 : i32
    %c0_i32_1 = arith.constant 0 : i32
    return %arg0, %c0_i32, %c0_i32_0 : i32, i32, i32
  }
}

</mosaic_0001>

<bundles_post_ra>
// kernel: bce_with_logits_loss.1
= control target key start
LH: loop header
LB: loop body
LE: loop exit
PB: predicated region body
PF: predicated region fallthrough
CT: control target
= control target key end

     0   :  { %10 = vsyncpa [#allocation3], 0  ;;  %s453_s0 = inlined_call_operand.hbm [shape: f32[8,512], index: 0, kind: input, shape index: {}]   ;;  %s454_s1 = inlined_call_operand.hbm [shape: f32[8,512], index: 1, kind: input, shape index: {}]   ;;  %s455_s2 = inlined_call_operand.vmem [shape: f32[8,1], index: 2, kind: input, shape index: {}]   ;;  %s456_s3 = inlined_call_operand.vmem [shape: f32[1,512], index: 3, kind: input, shape index: {}]   ;;  %s457_s4 = inlined_call_operand.hbm [shape: f32[8,512], index: 4, kind: input, shape index: {}]   ;;  %s458_s5 = inlined_call_operand.hbm [shape: f32[1,1,1], index: 5, kind: output, shape index: {}]  }
   0x1   :  { %11 = vsyncpa [#allocation6], 0 }
   0x2   :  { %12 = vsyncpa [#allocation4], 0  ;;  %s354_s18 = smov [#allocation5]   ;;  %s355_s20 = smov [#allocation2]  }
   0x3   :  { %s29_s19 = sshll.u32 %s354_s18, 4  ;;  %s19_s21 = sshll.u32 %s355_s20, 4  ;;  %s30_s19 = int_to_ptr.vmem [resolvable:$true] %s29_s19  ;;  %s20_s21 = int_to_ptr.vmem [resolvable:$true] %s19_s21 }
   0x4   :  { %s276_s22 = scalar_lea.vmem %s30_s19, 512  ;;  %p281_p1 = scmp.lt.s32.totalorder %s30_s19, %s30_s19 }
   0x5   :  { %p277_p0 = scmp.ne.s32.totalorder %s30_s19, %s276_s22  ;;  %p282_p2 = scmp.lt.s32.totalorder %s276_s22, %s276_s22 }
   0x7   :  { %p283_p3 = por %p282_p2, %p281_p1 }
   0x9   :  { %p284_p4 = pnand %p283_p3, %p277_p0 }
   0xb   :  { %287 = shalt.err (!%p284_p4)
}
   0xc   :  { %32 = dma.hbm_to_vmem [thread:$0]  %s454_s1, 512, %s30_s19, [#allocation6]  }
   0xd   :  { %s296_s25 = scalar_lea.vmem %s20_s21, 512  ;;  %p301_p6 = scmp.lt.s32.totalorder %s20_s21, %s20_s21 }
   0xe   :  { %p297_p5 = scmp.ne.s32.totalorder %s20_s21, %s296_s25  ;;  %p302_p7 = scmp.lt.s32.totalorder %s296_s25, %s296_s25 }
  0x10   :  { %p303_p8 = por %p302_p7, %p301_p6 }
  0x12   :  { %p304_p9 = pnand %p303_p8, %p297_p5 }
  0x14   :  { %307 = shalt.err (!%p304_p9)
}
  0x15   :  { %22 = dma.hbm_to_vmem [thread:$0]  %s453_s0, 512, %s20_s21, [#allocation3]  }
  0x16   :  { %s356_s28 = smov [#allocation7]  }
  0x17   :  { %s43_s29 = sshll.u32 %s356_s28, 4  ;;  %s44_s29 = int_to_ptr.vmem [resolvable:$true] %s43_s29 }
  0x18   :  { %s316_s30 = scalar_lea.vmem %s44_s29, 512  ;;  %p321_p11 = scmp.lt.s32.totalorder %s44_s29, %s44_s29 }
  0x19   :  { %p317_p10 = scmp.ne.s32.totalorder %s44_s29, %s316_s30  ;;  %p322_p12 = scmp.lt.s32.totalorder %s316_s30, %s316_s30 }
  0x1b   :  { %p323_p13 = por %p322_p12, %p321_p11 }
  0x1d   :  { %p324_p0 = pnand %p323_p13, %p317_p10 }
  0x1f   :  { %327 = shalt.err (!%p324_p0)
}
  0x20   :  { %46 = dma.hbm_to_vmem [thread:$0]  %s457_s4, 512, %s44_s29, [#allocation6]  }
  0x21   :  { %348 = dma.done.wait [#allocation3], 512  }
  0x22   :  { %349 = vsyncadd [#allocation3], 4294966784 }
  0x23   :  { %350 = dma.done.wait [#allocation6], 1024  }
  0x24   :  { %351 = vsyncadd [#allocation6], 4294966272  ;;  %v357_v0 = vmov 0   ;;  %v175_v1 = vld [vmem:[%s455_s2] sm:$0xff]  ;;  %v403_v3 = vld [vmem:[#allocation2 + $0x8] sm:$0xff]  ;;  %v131_v26 = vlaneseq  ;;  %vm225_vm5 = vcmask 0  }
  0x25   :  { %251 = vset.pattern.permute.xlu0 %v357_v0  ;;  %v401_v2 = vld [vmem:[#allocation2] sm:$0xff]  ;;  %v405_v4 = vld [vmem:[#allocation2 + $0x10] sm:$0xff]  ;;  %v65_v6 = vand.u32 2147483647, %v403_v3  ;;  %v409_v7 = vld [vmem:[#allocation2 + $0x18] sm:$0xff]  ;;  %v117_v34 = vsub.f32 0.0, %v403_v3 }
  0x26   :  { %178 = vperm.xlu0 %251, %v175_v1   ;;  %v64_v5 = vand.u32 2147483647, %v401_v2  ;;  %v66_v8 = vand.u32 2147483647, %v405_v4  ;;  %v67_v10 = vand.u32 2147483647, %v409_v7 }
  0x27   :  { %v69_v11 = vsub.f32 0.0, %v65_v6  ;;  %v132_v27 = vshrl.u32 %v131_v26, 7  ;;  %v128_v29 = vld [vmem:[%s456_s3] sm:$0xf]  ;;  %v116_v33 = vsub.f32 0.0, %v401_v2  ;;  %v118_v47 = vsub.f32 0.0, %v405_v4 }
  0x28   :  { %v68_v9 = vsub.f32 0.0, %v64_v5  ;;  %v70_v12 = vsub.f32 0.0, %v66_v8  ;;  %v71_v14 = vsub.f32 0.0, %v67_v10  ;;  %v243_v35 = vadd.f32 -1.0, %v128_v29  ;;  %v60_v53 = vld [vmem:[#allocation5] sm:$0xff]  ;;  %v61_v54 = vld [vmem:[#allocation5 + $0x8] sm:$0xff] }
  0x29   :  { %v74_v15 = vmul.f32 1.442695, %v69_v11  ;;  %v133_v32 = vsub.s32 0, %v132_v27  ;;  %v137_v36 = vsub.s32 1, %v132_v27  ;;  %v141_v37 = vsub.s32 2, %v132_v27  ;;  %v62_v55 = vld [vmem:[#allocation5 + $0x10] sm:$0xff] }
  0x2a   :  { %v72_v13 = vmul.f32 1.442695, %v68_v9  ;;  %v76_v16 = vmul.f32 1.442695, %v70_v12  ;;  %v78_v17 = vmul.f32 1.442695, %v71_v14 }
  0x2b   :  { %v145_v42 = vsub.s32 3, %v132_v27  ;;  %v120_v50 = vmax.f32 %v116_v33, 0.0  ;;  %v121_v51 = vmax.f32 %v117_v34, 0.0  ;;  %v134_v52 = vrot.slane %v243_v35, %v133_v32  ;;  %s358_s3 = smov [#allocation8]  }
  0x2c   :  { %252 = vpow2.f32 %v72_v13  ;;  %v138_v57 = vrot.slane %v243_v35, %v137_v36  ;;  %v142_v58 = vrot.slane %v243_v35, %v141_v37  ;;  %v119_v11 = vsub.f32 0.0, %v409_v7  ;;  %s233_s8 = sshll.u32 %s358_s3, 4  ;;  %s234_s8 = int_to_ptr.vmem [resolvable:$true] %s233_s8 }
  0x2d   :  { %254 = vpow2.f32 %v74_v15  ;;  %v151_v10 = vmul.f32 %v134_v52, %v60_v53  ;;  %v146_v12 = vrot.slane %v243_v35, %v145_v42  ;;  %v122_v13 = vmax.f32 %v118_v47, 0.0  ;;  %v63_v15 = vld [vmem:[#allocation5 + $0x18] sm:$0xff]  ;;  %v205_v52 = vld [vmem:[#allocation7 + $0x8] sm:$0xff]  ;;  %s328_s10 = scalar_lea.vmem %s234_s8, 16  ;;  %s332_s11 = scalar_lea.vmem %s234_s8, 32 }
  0x2e   :  { %256 = vpow2.f32 %v76_v16  ;;  %v152_v14 = vmul.f32 %v138_v57, %v61_v54  ;;  %v123_v27 = vmax.f32 %v119_v11, 0.0  ;;  %v161_v34 = vsub.f32 1.0, %v62_v55  ;;  %p329_p1 = scmp.ne.s32.totalorder %s234_s8, %s328_s10  ;;  %p333_p2 = scmp.lt.s32.totalorder %s234_s8, %s234_s8 }
  0x2f   :  { %258 = vpow2.f32 %v78_v17  ;;  %v162_v37 = vsub.f32 1.0, %v63_v15  ;;  %p334_p3 = scmp.lt.s32.totalorder %s332_s11, %s328_s10 }
  0x30   :  { %v165_v42 = vmul.f32 %v161_v34, %v405_v4 }
  0x31   :  { %p335_p4 = por %p334_p3, %p333_p2 }
  0x33   :  { %p336_p5 = pnand %p335_p4, %p329_p1 }
  0x39   :  { %v253_v18 = vpop.eup %252 }
  0x3a   :  { %v255_v19 = vpop.eup %254  ;;  %v80_v21 = vadd.f32 1.0, %v253_v18  ;;  %v83_v28 = vmul.f32 -0.5, %v253_v18  ;;  %v86_v44 = vand.u32 2147483647, %v253_v18 }
  0x3b   :  { %v257_v20 = vpop.eup %256  ;;  %v89_v23 = vadd.f32 1.0, %v255_v19  ;;  %v92_v30 = vmul.f32 -0.5, %v255_v19  ;;  %v95_v45 = vand.u32 2147483647, %v255_v19 }
  0x3c   :  { %v413_v22 = vpop.eup %258  ;;  %v98_v24 = vadd.f32 1.0, %v257_v20  ;;  %260 = vlog2.f32 %v80_v21  ;;  %v101_v31 = vmul.f32 -0.5, %v257_v20  ;;  %v84_v38 = vadd.f32 1.0, %v83_v28 }
  0x3d   :  { %v107_v25 = vadd.f32 1.0, %v413_v22  ;;  %262 = vlog2.f32 %v89_v23  ;;  %v110_v39 = vmul.f32 -0.5, %v413_v22  ;;  %v93_v41 = vadd.f32 1.0, %v92_v30 }
  0x3e   :  { %264 = vlog2.f32 %v98_v24  ;;  %v102_v46 = vadd.f32 1.0, %v101_v31  ;;  %v104_v49 = vand.u32 2147483647, %v257_v20  ;;  %v85_v56 = vmul.f32 %v253_v18, %v84_v38 }
  0x3f   :  { %266 = vlog2.f32 %v107_v25  ;;  %v111_v59 = vadd.f32 1.0, %v110_v39  ;;  %v94_v63 = vmul.f32 %v255_v19, %v93_v41  ;;  %v113_v0 = vand.u32 2147483647, %v413_v22 }
  0x40   :  { %vm425_vm0 = vcmp.lt.f32.partialorder %v86_v44, 0.0004427343  ;;  %vm429_vm1 = vcmp.lt.f32.partialorder %v95_v45, 0.0004427343  ;;  %v103_v8 = vmul.f32 %v257_v20, %v102_v46  ;;  %vm433_vm2 = vcmp.lt.f32.partialorder %v104_v49, 0.0004427343 }
  0x41   :  { %v112_v17 = vmul.f32 %v413_v22, %v111_v59  ;;  %v153_v20 = vmul.f32 %v142_v58, %v62_v55  ;;  %vm114_vm3 = vcmp.lt.f32.partialorder %v113_v0, 0.0004427343  ;;  %v159_v23 = vsub.f32 1.0, %v60_v53 }
  0x42   :  { %v155_v24 = vadd.f32 1.0, %v151_v10  ;;  %v160_v25 = vsub.f32 1.0, %v61_v54  ;;  %v154_v28 = vmul.f32 %v146_v12, %v63_v15  ;;  %v156_v31 = vadd.f32 1.0, %v152_v14 }
  0x43   :  { %v157_v33 = vadd.f32 1.0, %v153_v20  ;;  %v163_v38 = vmul.f32 %v159_v23, %v401_v2  ;;  %v186_v44 = vand.u32 127, %v131_v26  ;;  %v166_v45 = vmul.f32 %v162_v37, %v409_v7  ;;  %v207_v26 = vld [vmem:[#allocation7 + $0x18] sm:$0xff] }
  0x44   :  { %v158_v36 = vadd.f32 1.0, %v154_v28  ;;  %v164_v39 = vmul.f32 %v160_v25, %v403_v3  ;;  %v204_v3 = vld [vmem:[#allocation7] sm:$0xff] }
  0x45   :  { %vm196_vm4 = vcmp.eq.s32.totalorder %v186_v44, 5 }
  0x49   :  { %v261_v40 = vpop.eup %260 }
  0x4a   :  { %v263_v43 = vpop.eup %262  ;;  %v82_v61 = vmul.f32 0.6931472, %v261_v40 }
  0x4b   :  { %v265_v48 = vpop.eup %264  ;;  %v91_v62 = vmul.f32 0.6931472, %v263_v43 }
  0x4c   :  { %v267_v60 = vpop.eup %266  ;;  %v100_v6 = vmul.f32 0.6931472, %v265_v48  ;;  %v88_v18 = vsel %vm425_vm0, %v85_v56, %v82_v61  ;;  %v206_v56 = vld [vmem:[#allocation7 + $0x10] sm:$0xff] }
  0x4d   :  { %v109_v16 = vmul.f32 0.6931472, %v267_v60  ;;  %v97_v19 = vsel %vm429_vm1, %v94_v63, %v91_v62  ;;  %v124_v29 = vadd.f32 %v120_v50, %v88_v18 }
  0x4e   :  { %v106_v21 = vsel %vm433_vm2, %v103_v8, %v100_v6  ;;  %v125_v30 = vadd.f32 %v121_v51, %v97_v19 }
  0x4f   :  { %v115_v22 = vsel %vm114_vm3, %v112_v17, %v109_v16  ;;  %v126_v32 = vadd.f32 %v122_v13, %v106_v21  ;;  %v167_v40 = vmul.f32 %v155_v24, %v124_v29 }
  0x50   :  { %v127_v35 = vadd.f32 %v123_v27, %v115_v22  ;;  %v168_v41 = vmul.f32 %v156_v31, %v125_v30 }
  0x51   :  { %v169_v43 = vmul.f32 %v157_v33, %v126_v32  ;;  %v171_v47 = vadd.f32 %v167_v40, %v163_v38 }
  0x52   :  { %v170_v46 = vmul.f32 %v158_v36, %v127_v35  ;;  %v172_v48 = vadd.f32 %v168_v41, %v164_v39 }
  0x53   :  { %v173_v49 = vadd.f32 %v169_v43, %v165_v42 }
  0x54   :  { %v174_v51 = vadd.f32 %v170_v46, %v166_v45 }
  0xa1   :  { %v179_v50 = vpop.permute.xlu0 %178 }
  0xa2   :  { %v181_v2 = vmul.f32 %v179_v50, %v171_v47  ;;  %v182_v53 = vmul.f32 %v179_v50, %v172_v48  ;;  %v183_v54 = vmul.f32 %v179_v50, %v173_v49  ;;  %v184_v57 = vmul.f32 %v179_v50, %v174_v51 }
  0xa4   :  { %v200_v55 = vsel %vm196_vm4, 0.0, %v181_v2  ;;  %v209_v4 = vmul.f32 %v205_v52, %v182_v53  ;;  %v210_v59 = vmul.f32 %v206_v56, %v183_v54  ;;  %v211_v60 = vmul.f32 %v207_v26, %v184_v57 }
  0xa5   :  { %v208_v58 = vmul.f32 %v204_v3, %v200_v55 }
  0xa7   :  { %v212_v7 = vadd.f32 %v209_v4, %v208_v58 }
  0xa9   :  { %v213_v61 = vadd.f32 %v212_v7, %v210_v59 }
  0xab   :  { %v214_v62 = vadd.f32 %v213_v61, %v211_v60 }
  0xad   :  { %215 = vadd.xlane.f32.xlu0 %v214_v62 }
 0x136   :  { %v216_v63 = vpop.xlane.xlu0 %215 }
 0x137   :  { %v217_v0 = vrot.slane %v216_v63, 4 }
 0x139   :  { %v218_v1 = vadd.f32 %v217_v0, %v216_v63 }
 0x13b   :  { %v219_v5 = vrot.slane %v218_v1, 2 }
 0x13d   :  { %v220_v6 = vadd.f32 %v219_v5, %v218_v1 }
 0x13f   :  { %v221_v8 = vrot.slane %v220_v6, 1 }
 0x141   :  { %v222_v9 = vadd.f32 %v221_v8, %v220_v6 }
 0x143   :  { %244 = vpush %v222_v9 }
 0x174   :  { %s245_s9 = spop %244 }
 0x175   :  { %v224_v10 = vstv %s245_s9 }
 0x176   :  { %226 = vst.msk [vmem:[#allocation8] sm:$0x1] %vm225_vm5, %v224_v10 }
 0x177   :  { %339 = shalt.err (!%p336_p5)
}
 0x178   :  { %236 = dma.vmem_to_hbm [thread:$0]  %s234_s8, 16, %s458_s5, [#allocation4]  }
 0x179   :  { %352 = dma.done.wait [#allocation4], 16  }
 0x17a   :  { %353 = vsyncadd [#allocation4], 4294967280 }
 0x17b   :  { %240 = vsyncpa [#allocation3], 1 }
 0x17c   :  { %241 = vsyncpa [#allocation6], 1 }
 0x17d   :  { %242 = vsyncpa [#allocation4], 1 }

</bundles_post_ra>
